<compile_context>
chip_gen: v7x
topology: tpu7x:2x2x1
jax: 0.10.0
libtpu: 0.0.40
codegen_flags: <defaults>
</compile_context>

<pallas_src>
import jax
import jax.numpy as jnp
from jax.experimental import pallas as pl
from jax.experimental.pallas import tpu as pltpu

LANE = 128
HIDDEN = 100          # logical hidden size (matches nn.Linear(1, 100))
HP = 104              # hidden padded to a multiple of 8 sublanes (do NOT pad to 128)
CHUNK = 256           # inner batch chunk (lanes); h chunk = (HP, CHUNK) ~ 26 vregs
MIN_SPLIT = 4096      # only force >=2 grid steps once tiles would stay >= this many lanes


def mlp_kernel(x_ref, w1_ref, b1_ref, w2_ref, b2_ref, o_ref):
    # x:  (1, TB)   batch tile, lane-dense
    # w1: (HP, 1)   fc1 weight column (VMEM, resident across grid steps)
    # b1: (HP, 1)   fc1 bias column   (VMEM, resident)
    # w2: (1, HP)   fc2 weight row    (VMEM, resident)
    # b2: (1, 1)    fc2 bias scalar   (SMEM)
    # o:  (1, TB)
    w1 = w1_ref[...]
    b1 = b1_ref[...]
    w2 = w2_ref[...]
    b2 = b2_ref[0, 0]
    n_chunks = o_ref.shape[-1] // CHUNK   # static (TB is a multiple of CHUNK)

    @pl.loop(0, n_chunks)
    def _(c):
        i = pl.multiple_of(c * CHUNK, CHUNK)
        x = x_ref[:, pl.ds(i, CHUNK)]                                   # (1, CHUNK)
        # fc1 + ReLU on the VPU: broadcast outer product, lives in vregs only.
        h = jnp.maximum(w1 * x + b1, 0.0)                               # (HP, CHUNK)
        # fc2 on the MXU: (1, HP) @ (HP, CHUNK), f32 accumulation.
        out = jnp.dot(w2, h, preferred_element_type=jnp.float32)        # (1, CHUNK)
        o_ref[:, pl.ds(i, CHUNK)] = (out + b2).astype(o_ref.dtype)


def _choose_tb(B, tb_cap):
    """Pick the batch tile (lanes): a multiple of CHUNK, as large as the cap allows
    (amortize per-step overhead), but split into >= 2 grid steps for megacore once
    the batch is big enough that the split keeps tiles >= MIN_SPLIT lanes."""
    tb_cap = max(CHUNK, (tb_cap // CHUNK) * CHUNK)
    lanes = pl.cdiv(B, CHUNK) * CHUNK
    tb = min(tb_cap, lanes)
    if lanes >= 2 * MIN_SPLIT:
        half = pl.cdiv(pl.cdiv(lanes, 2), CHUNK) * CHUNK
        tb = min(tb, half)
    return tb


def mlp_forward(x, w1, b1, w2, b2, *, tb_cap=65536):
    """x: (B, 1) float32 (PyTorch layout). w1: (100, 1), b1: (100,), w2: (1, 100), b2: (1,).
    Returns (B, 1) float32 == fc2(relu(fc1(x)))."""
    B = x.shape[0]
    tb = _choose_tb(B, tb_cap)

    # (B,1) -> (1,B) is a row-major layout no-op: no pad copy, no output slice.
    xr = x.reshape(1, B).astype(jnp.float32)

    # Zero-pad the hidden dim to HP sublanes (tiny host-side op, results stay exact).
    w1c = jnp.zeros((HP, 1), jnp.float32).at[:HIDDEN, :].set(
        w1.reshape(HIDDEN, 1).astype(jnp.float32))
    b1c = jnp.zeros((HP, 1), jnp.float32).at[:HIDDEN, :].set(
        b1.reshape(HIDDEN, 1).astype(jnp.float32))
    w2r = jnp.zeros((1, HP), jnp.float32).at[:, :HIDDEN].set(
        w2.reshape(1, HIDDEN).astype(jnp.float32))
    b2s = b2.reshape(1, 1).astype(jnp.float32)

    const = lambda i: (0, 0)   # tiny weights/biases: constant block, stay resident

    out = pl.pallas_call(
        mlp_kernel,
        out_shape=jax.ShapeDtypeStruct((1, B), jnp.float32),
        grid=(pl.cdiv(B, tb),),
        in_specs=[
            pl.BlockSpec((1, tb), lambda i: (0, i)),             # x batch tile
            pl.BlockSpec((HP, 1), const),                        # w1
            pl.BlockSpec((HP, 1), const),                        # b1
            pl.BlockSpec((1, HP), const),                        # w2
            pl.BlockSpec(memory_space=pltpu.MemorySpace.SMEM),   # b2 scalar in SMEM
        ],
        out_specs=pl.BlockSpec((1, tb), lambda i: (0, i)),
        compiler_params=pltpu.CompilerParams(
            dimension_semantics=("parallel",),    # megacore sharding on v7x
            # Explicit VMEM budget with ample headroom: double-buffered in/out tiles
            # are only ~4*tb*4 bytes (<=1 MiB at tb=64K); the chunked h never spills.
            vmem_limit_bytes=32 * 1024 * 1024,
        ),
        cost_estimate=pl.CostEstimate(
            flops=4 * B * HP,                     # 2 MACs/hidden/elem x 2 layers
            transcendentals=0,
            bytes_accessed=8 * B + 4 * (3 * HP + 1),
        ),
    )(xr, w1c, b1c, w2r, b2s)

    return out.reshape(B, 1)


def init_params(key):
    """Deterministic init mimicking nn.Linear default uniform(-1/sqrt(fan_in), 1/sqrt(fan_in))."""
    k1, k2, k3, k4 = jax.random.split(key, 4)
    bound1 = 1.0  # 1/sqrt(1)
    w1 = jax.random.uniform(k1, (HIDDEN, 1), jnp.float32, -bound1, bound1)   # fc1.weight
    b1 = jax.random.uniform(k2, (HIDDEN,), jnp.float32, -bound1, bound1)     # fc1.bias
    bound2 = 1.0 / jnp.sqrt(float(HIDDEN))
    w2 = jax.random.uniform(k3, (1, HIDDEN), jnp.float32, -bound2, bound2)   # fc2.weight
    b2 = jax.random.uniform(k4, (1,), jnp.float32, -bound2, bound2)          # fc2.bias
    return w1, b1, w2, b2


def mlp_ref(x, w1, b1, w2, b2):
    # Plain JAX reference, same math as the PyTorch forward.
    return jnp.maximum(x @ w1.T + b1, 0.0) @ w2.T + b2


if __name__ == "__main__":
    key = jax.random.PRNGKey(0)
    kx, kp = jax.random.split(key)
    w1, b1, w2, b2 = init_params(kp)

    # Small batch: single tile, ragged (only 8 of 256 lanes valid -> masked writeback).
    B = 8
    x = jax.random.normal(kx, (B, 1), jnp.float32)
    out = mlp_forward(x, w1, b1, w2, b2)
    jax.block_until_ready(out)
    assert out.shape == (B, 1)
    assert jnp.allclose(out, mlp_ref(x, w1, b1, w2, b2), atol=1e-5, rtol=1e-5), \
        "mismatch vs reference (B=8)"

    # Ragged batch + multi-step grid (2 tiles, last one partially valid).
    B2 = 300
    x2 = jax.random.normal(jax.random.PRNGKey(1), (B2, 1), jnp.float32)
    out2 = mlp_forward(x2, w1, b1, w2, b2, tb_cap=256)
    jax.block_until_ready(out2)
    assert jnp.allclose(out2, mlp_ref(x2, w1, b1, w2, b2), atol=1e-5, rtol=1e-5), \
        "mismatch vs reference (B=300)"

    # Larger batch: exercises the >=2-step megacore split and the inner chunk loop.
    B3 = 10000
    x3 = jax.random.normal(jax.random.PRNGKey(2), (B3, 1), jnp.float32)
    out3 = mlp_forward(x3, w1, b1, w2, b2)
    jax.block_until_ready(out3)
    assert jnp.allclose(out3, mlp_ref(x3, w1, b1, w2, b2), atol=1e-4, rtol=1e-5), \
        "mismatch vs reference (B=10000)"

    print("KERNEL_OK")
</pallas_src>

<mosaic_0001>
module attributes {stable_mosaic.version = 11 : i64} {
  func.func @mlp_kernel(%arg0: i32, %arg1: memref<1x256xf32, #tpu.memory_space<vmem>>, %arg2: memref<104x1xf32, #tpu.memory_space<vmem>>, %arg3: memref<104x1xf32, #tpu.memory_space<vmem>>, %arg4: memref<1x104xf32, #tpu.memory_space<vmem>>, %arg5: memref<1x1xf32, #tpu.memory_space<smem>>, %arg6: memref<1x256xf32, #tpu.memory_space<vmem>>) attributes {dimension_semantics = [#tpu.dimension_semantics<parallel>], iteration_bounds = array<i64: 1>, scalar_prefetch = 0 : i64, scratch_operands = 0 : i64, tpu.core_type = #tpu.core_type<tc>, window_params = [{transform_indices = @transform_0, window_bounds = array<i64: 1, 256>}, {pipeline_mode = #tpu.pipeline_mode<synchronous>, transform_indices = @transform_1, window_bounds = array<i64: 104, 1>}, {pipeline_mode = #tpu.pipeline_mode<synchronous>, transform_indices = @transform_2, window_bounds = array<i64: 104, 1>}, {pipeline_mode = #tpu.pipeline_mode<synchronous>, transform_indices = @transform_3, window_bounds = array<i64: 1, 104>}, {transform_indices = @transform_4, window_bounds = array<i64: 1, 1>}, {transform_indices = @transform_5, window_bounds = array<i64: 1, 256>}]} {
    %c0 = arith.constant 0 : index
    %c0_0 = arith.constant 0 : index
    %0 = vector.load %arg2[%c0, %c0_0] : memref<104x1xf32, #tpu.memory_space<vmem>>, vector<104x1xf32>
    %c0_1 = arith.constant 0 : index
    %c0_2 = arith.constant 0 : index
    %1 = vector.load %arg3[%c0_1, %c0_2] : memref<104x1xf32, #tpu.memory_space<vmem>>, vector<104x1xf32>
    %c0_3 = arith.constant 0 : index
    %c0_4 = arith.constant 0 : index
    %2 = vector.load %arg4[%c0_3, %c0_4] : memref<1x104xf32, #tpu.memory_space<vmem>>, vector<1x104xf32>
    %c0_5 = arith.constant 0 : index
    %c0_6 = arith.constant 0 : index
    %3 = memref.load %arg5[%c0_5, %c0_6] : memref<1x1xf32, #tpu.memory_space<smem>>
    %c0_i32 = arith.constant 0 : i32
    %c1_i32 = arith.constant 1 : i32
    %4 = arith.muli %c0_i32, %c1_i32 : i32
    %c0_i32_7 = arith.constant 0 : i32
    %5 = arith.addi %c0_i32_7, %4 : i32
    %c256_i32 = arith.constant 256 : i32
    %6 = arith.muli %5, %c256_i32 : i32
    %7 = tpu.assume_multiple %6, 256 : i32
    %c0_8 = arith.constant 0 : index
    %8 = arith.index_cast %7 : i32 to index
    %9 = vector.load %arg1[%c0_8, %8] : memref<1x256xf32, #tpu.memory_space<vmem>>, vector<1x256xf32>
    %10 = vector.broadcast %0 : vector<104x1xf32> to vector<104x256xf32>
    %11 = vector.broadcast %9 : vector<1x256xf32> to vector<104x256xf32>
    %12 = arith.mulf %10, %11 : vector<104x256xf32>
    %13 = vector.broadcast %1 : vector<104x1xf32> to vector<104x256xf32>
    %14 = arith.addf %12, %13 : vector<104x256xf32>
    %cst = arith.constant 0.000000e+00 : f32
    %15 = vector.broadcast %cst : f32 to vector<104x256xf32>
    %16 = arith.maximumf %14, %15 : vector<104x256xf32>
    %cst_9 = arith.constant dense<0.000000e+00> : vector<1x256xf32>
    %17 = tpu.matmul %2, %16, %cst_9 {dimension_numbers = #tpu.dot_dimension_numbers<[1], [0], [0], [1], [0, 0, 1, 1], [], []>} : vector<1x104xf32>, vector<104x256xf32>, vector<1x256xf32> -> vector<1x256xf32>
    %18 = vector.broadcast %3 : f32 to vector<1x256xf32>
    %19 = arith.addf %17, %18 : vector<1x256xf32>
    %c0_10 = arith.constant 0 : index
    %20 = arith.index_cast %7 : i32 to index
    %21 = vector.load %arg6[%c0_10, %20] : memref<1x256xf32, #tpu.memory_space<vmem>>, vector<1x256xf32>
    tpu.vector_store %arg6[%c0_10, %20], %19 {strides = array<i32>} : memref<1x256xf32, #tpu.memory_space<vmem>>, vector<1x256xf32>,
    %c1_i32_11 = arith.constant 1 : i32
    return
  }
  func.func @transform_0(%arg0: i32) -> (i32, i32) {
    %c0_i32 = arith.constant 0 : i32
    %c0_i32_0 = arith.constant 0 : i32
    return %c0_i32, %arg0 : i32, i32
  }
  func.func @transform_1(%arg0: i32) -> (i32, i32) {
    %c0_i32 = arith.constant 0 : i32
    %c0_i32_0 = arith.constant 0 : i32
    %c0_i32_1 = arith.constant 0 : i32
    return %c0_i32, %c0_i32_0 : i32, i32
  }
  func.func @transform_2(%arg0: i32) -> (i32, i32) {
    %c0_i32 = arith.constant 0 : i32
    %c0_i32_0 = arith.constant 0 : i32
    %c0_i32_1 = arith.constant 0 : i32
    return %c0_i32, %c0_i32_0 : i32, i32
  }
  func.func @transform_3(%arg0: i32) -> (i32, i32) {
    %c0_i32 = arith.constant 0 : i32
    %c0_i32_0 = arith.constant 0 : i32
    %c0_i32_1 = arith.constant 0 : i32
    return %c0_i32, %c0_i32_0 : i32, i32
  }
  func.func @transform_4(%arg0: i32) -> (i32, i32) {
    %c0_i32 = arith.constant 0 : i32
    %c0_i32_0 = arith.constant 0 : i32
    %c0_i32_1 = arith.constant 0 : i32
    return %c0_i32, %c0_i32_0 : i32, i32
  }
  func.func @transform_5(%arg0: i32) -> (i32, i32) {
    %c0_i32 = arith.constant 0 : i32
    %c0_i32_0 = arith.constant 0 : i32
    return %c0_i32, %arg0 : i32, i32
  }
}

</mosaic_0001>

<bundles_post_ra>
// kernel: tpu_custom_call.1
= control target key start
LH: loop header
LB: loop body
LE: loop exit
PB: predicated region body
PF: predicated region fallthrough
CT: control target
= control target key end

     0   :  { %v438_v2 = vmov 0   ;;  %s608_s0 = inlined_call_operand.vmem [shape: f32[1,8], index: 0, kind: input, shape index: {}]   ;;  %s609_s1 = inlined_call_operand.vmem [shape: f32[104,1], index: 1, kind: input, shape index: {}]   ;;  %s610_s2 = inlined_call_operand.vmem [shape: f32[104,1], index: 2, kind: input, shape index: {}]   ;;  %s611_s3 = inlined_call_operand.vmem [shape: f32[1,104], index: 3, kind: input, shape index: {}]   ;;  %s612_s4 = inlined_call_operand.<no memory space> [shape: f32[1,1], index: 4, kind: input, shape index: {}]   ;;  %s613_s5 = inlined_call_operand.hbm [shape: f32[1,8], index: 5, kind: output, shape index: {}]  }
   0x1   :  { %v35_v0 = vld [vmem:[%s610_s2] sm:$0xff]  ;;  %413 = vset.pattern.permute.xlu1 %v438_v2  ;;  %412 = vset.pattern.permute.xlu0 %v438_v2  ;;  %v36_v3 = vld [vmem:[%s610_s2 + $0x8] sm:$0xff]  ;;  %v25_v5 = vld [vmem:[%s609_s1 + $0x18] sm:$0xff] }
   0x2   :  { %v22_v1 = vld [vmem:[%s609_s1] sm:$0xff]  ;;  %155 = vperm.xlu1 %413, %v35_v0   ;;  %v23_v4 = vld [vmem:[%s609_s1 + $0x8] sm:$0xff]  ;;  %v24_v6 = vld [vmem:[%s609_s1 + $0x10] sm:$0xff] }
   0x3   :  { %53 = vperm.xlu0 %412, %v22_v1  }
   0x6   :  { %160 = vperm.xlu1 %413, %v36_v3  }
   0x7   :  { %58 = vperm.xlu0 %412, %v23_v4  }
   0x8   :  { %11 = vsyncpa [#allocation4], 0  ;;  %v38_v7 = vld [vmem:[%s610_s2 + $0x18] sm:$0xff]  ;;  %v37_v8 = vld [vmem:[%s610_s2 + $0x10] sm:$0xff]  ;;  %v439_v27 = vmov 0.0   ;;  %v117_v28 = vlaneseq  ;;  %vm271_vm0 = vcmask 850944  }
   0x9   :  { %v27_v9 = vld [vmem:[%s609_s1 + $0x28] sm:$0xff]  ;;  %v26_v10 = vld [vmem:[%s609_s1 + $0x20] sm:$0xff]  ;;  %v29_v13 = vld [vmem:[%s609_s1 + $0x38] sm:$0xff]  ;;  %339 = vmatprep.mubr.f32.mxu0 %v439_v27 }
   0xa   :  { %68 = vperm.xlu1 %413, %v25_v5   ;;  %v40_v11 = vld [vmem:[%s610_s2 + $0x28] sm:$0xff]  ;;  %v39_v12 = vld [vmem:[%s610_s2 + $0x20] sm:$0xff]  ;;  %v28_v14 = vld [vmem:[%s609_s1 + $0x30] sm:$0xff]  ;;  %v551_v29 = vshrl.u32 %v117_v28, 7  ;;  %vm366_vm1 = vcmp.lt.s32.totalorder %v117_v28, 256 }
   0xb   :  { %63 = vperm.xlu0 %412, %v24_v6   ;;  %v42_v15 = vld [vmem:[%s610_s2 + $0x38] sm:$0xff]  ;;  %v41_v16 = vld [vmem:[%s610_s2 + $0x30] sm:$0xff]  ;;  %v31_v17 = vld [vmem:[%s609_s1 + $0x48] sm:$0xff] }
   0xc   :  { %v30_v18 = vld [vmem:[%s609_s1 + $0x40] sm:$0xff]  ;;  %v44_v19 = vld [vmem:[%s610_s2 + $0x48] sm:$0xff]  ;;  %v33_v21 = vld [vmem:[%s609_s1 + $0x58] sm:$0xff]  ;;  %v119_v30 = vsub.s32 0, %v551_v29  ;;  %v123_v31 = vsub.s32 1, %v551_v29 }
   0xd   :  { %v43_v20 = vld [vmem:[%s610_s2 + $0x40] sm:$0xff]  ;;  %v32_v22 = vld [vmem:[%s609_s1 + $0x50] sm:$0xff]  ;;  %v46_v23 = vld [vmem:[%s610_s2 + $0x58] sm:$0xff] }
   0xe   :  { %170 = vperm.xlu1 %413, %v38_v7   ;;  %v45_v24 = vld [vmem:[%s610_s2 + $0x50] sm:$0xff]  ;;  %v47_v25 = vld [vmem:[%s610_s2 + $0x60] sm:$0xff] }
   0xf   :  { %165 = vperm.xlu0 %412, %v37_v8   ;;  %v34_v26 = vld [vmem:[%s609_s1 + $0x60] sm:$0xff] }
  0x10   :  { %v50_v32 = vld [vmem:[%s608_s0] sm:$0x3] }
  0x11   :  { %v558_v33 = vrot.slane %v50_v32, %v119_v30  ;;  %v560_v34 = vrot.slane %v50_v32, %v123_v31 }
  0x12   :  { %78 = vperm.xlu1 %413, %v27_v9  }
  0x13   :  { %73 = vperm.xlu0 %412, %v26_v10  }
  0x16   :  { %180 = vperm.xlu1 %413, %v40_v11  }
  0x17   :  { %175 = vperm.xlu0 %412, %v39_v12  }
  0x1a   :  { %88 = vperm.xlu1 %413, %v29_v13  }
  0x1b   :  { %83 = vperm.xlu0 %412, %v28_v14  }
  0x1e   :  { %190 = vperm.xlu1 %413, %v42_v15  }
  0x1f   :  { %185 = vperm.xlu0 %412, %v41_v16  }
  0x22   :  { %98 = vperm.xlu1 %413, %v31_v17  }
  0x23   :  { %93 = vperm.xlu0 %412, %v30_v18  }
  0x26   :  { %200 = vperm.xlu1 %413, %v44_v19  }
  0x27   :  { %195 = vperm.xlu0 %412, %v43_v20  }
  0x2a   :  { %108 = vperm.xlu1 %413, %v33_v21  }
  0x2b   :  { %103 = vperm.xlu0 %412, %v32_v22  }
  0x2e   :  { %210 = vperm.xlu1 %413, %v46_v23  }
  0x2f   :  { %205 = vperm.xlu0 %412, %v45_v24  }
  0x32   :  { %215 = vperm.xlu1 %413, %v47_v25  }
  0x33   :  { %113 = vperm.xlu0 %412, %v34_v26  }
  0x81   :  { %v156_v35 = vpop.permute.xlu1 %155 }
  0x82   :  { %v54_v36 = vpop.permute.xlu0 %53 }
  0x83   :  { %v127_v37 = vmul.f32 %v558_v33, %v54_v36  ;;  %v128_v38 = vmul.f32 %v560_v34, %v54_v36 }
  0x85   :  { %v161_v39 = vpop.permute.xlu1 %160  ;;  %v218_v43 = vadd.f32 %v156_v35, %v127_v37  ;;  %v219_v44 = vadd.f32 %v156_v35, %v128_v38 }
  0x86   :  { %v59_v40 = vpop.permute.xlu0 %58 }
  0x87   :  { %v129_v41 = vmul.f32 %v558_v33, %v59_v40  ;;  %v130_v42 = vmul.f32 %v560_v34, %v59_v40  ;;  %v245_v49 = vmax.f32 %v219_v44, 0.0  ;;  %v244_v51 = vmax.f32 %v218_v43, 0.0 }
  0x89   :  { %v220_v45 = vadd.f32 %v161_v39, %v129_v41  ;;  %v221_v46 = vadd.f32 %v161_v39, %v130_v42  ;;  %v69_v47 = vpop.permute.xlu1 %68 }
  0x8a   :  { %v64_v48 = vpop.permute.xlu0 %63  ;;  %v133_v53 = vmul.f32 %v558_v33, %v69_v47  ;;  %v134_v54 = vmul.f32 %v560_v34, %v69_v47 }
  0x8b   :  { %v247_v50 = vmax.f32 %v221_v46, 0.0  ;;  %v246_v52 = vmax.f32 %v220_v45, 0.0  ;;  %v131_v55 = vmul.f32 %v558_v33, %v64_v48  ;;  %v132_v56 = vmul.f32 %v560_v34, %v64_v48 }
  0x8d   :  { %v171_v57 = vpop.permute.xlu1 %170  ;;  %v384_v59 = vpack.c.bf16 %v247_v50, %v245_v49  ;;  %v386_v60 = vpack.c.bf16 %v246_v52, %v244_v51 }
  0x8e   :  { %v166_v58 = vpop.permute.xlu0 %165  ;;  %v224_v61 = vadd.f32 %v171_v57, %v133_v53  ;;  %v225_v62 = vadd.f32 %v171_v57, %v134_v54 }
  0x8f   :  { %v222_v63 = vadd.f32 %v166_v58, %v131_v55  ;;  %v223_v0 = vadd.f32 %v166_v58, %v132_v56  ;;  %385 = vmatprep.subr.bf16.mxu0 %v384_v59 }
  0x90   :  { %v250_v1 = vmax.f32 %v224_v61, 0.0  ;;  %v251_v2 = vmax.f32 %v225_v62, 0.0  ;;  %387 = vmatpush1.bf16.msra.mxu0 %v386_v60 }
  0x91   :  { %v248_v3 = vmax.f32 %v222_v63, 0.0  ;;  %v249_v4 = vmax.f32 %v223_v0, 0.0  ;;  %v79_v5 = vpop.permute.xlu1 %78 }
  0x92   :  { %v74_v6 = vpop.permute.xlu0 %73  ;;  %v137_v9 = vmul.f32 %v558_v33, %v79_v5  ;;  %v138_v10 = vmul.f32 %v560_v34, %v79_v5 }
  0x93   :  { %v388_v7 = vpack.c.bf16 %v251_v2, %v249_v4  ;;  %v390_v8 = vpack.c.bf16 %v250_v1, %v248_v3  ;;  %v135_v11 = vmul.f32 %v558_v33, %v74_v6  ;;  %v136_v12 = vmul.f32 %v560_v34, %v74_v6 }
  0x95   :  { %389 = vmatprep.subr.bf16.mxu0 %v388_v7  ;;  %v181_v13 = vpop.permute.xlu1 %180 }
  0x96   :  { %v176_v14 = vpop.permute.xlu0 %175  ;;  %v228_v15 = vadd.f32 %v181_v13, %v137_v9  ;;  %v229_v16 = vadd.f32 %v181_v13, %v138_v10  ;;  %391 = vmatpush1.bf16.msra.mxu0 %v390_v8 }
  0x97   :  { %v226_v17 = vadd.f32 %v176_v14, %v135_v11  ;;  %v227_v18 = vadd.f32 %v176_v14, %v136_v12 }
  0x98   :  { %v254_v19 = vmax.f32 %v228_v15, 0.0  ;;  %v255_v20 = vmax.f32 %v229_v16, 0.0 }
  0x99   :  { %v252_v21 = vmax.f32 %v226_v17, 0.0  ;;  %v253_v22 = vmax.f32 %v227_v18, 0.0  ;;  %v89_v23 = vpop.permute.xlu1 %88 }
  0x9a   :  { %v84_v24 = vpop.permute.xlu0 %83  ;;  %v141_v27 = vmul.f32 %v558_v33, %v89_v23  ;;  %v142_v30 = vmul.f32 %v560_v34, %v89_v23 }
  0x9b   :  { %v392_v25 = vpack.c.bf16 %v255_v20, %v253_v22  ;;  %v394_v26 = vpack.c.bf16 %v254_v19, %v252_v21  ;;  %v139_v31 = vmul.f32 %v558_v33, %v84_v24  ;;  %v140_v32 = vmul.f32 %v560_v34, %v84_v24 }
  0x9d   :  { %393 = vmatprep.subr.bf16.mxu0 %v392_v25  ;;  %v191_v35 = vpop.permute.xlu1 %190 }
  0x9e   :  { %v186_v36 = vpop.permute.xlu0 %185  ;;  %v232_v37 = vadd.f32 %v191_v35, %v141_v27  ;;  %v233_v38 = vadd.f32 %v191_v35, %v142_v30  ;;  %395 = vmatpush1.bf16.msra.mxu0 %v394_v26  ;;  %v48_v27 = vld [vmem:[%s611_s3] sm:$0x1] }
  0x9f   :  { %v230_v39 = vadd.f32 %v186_v36, %v139_v31  ;;  %v231_v40 = vadd.f32 %v186_v36, %v140_v32 }
  0xa0   :  { %v258_v41 = vmax.f32 %v232_v37, 0.0  ;;  %v259_v42 = vmax.f32 %v233_v38, 0.0 }
  0xa1   :  { %v256_v43 = vmax.f32 %v230_v39, 0.0  ;;  %v257_v44 = vmax.f32 %v231_v40, 0.0  ;;  %v99_v45 = vpop.permute.xlu1 %98 }
  0xa2   :  { %v94_v46 = vpop.permute.xlu0 %93  ;;  %v145_v49 = vmul.f32 %v558_v33, %v99_v45  ;;  %v146_v50 = vmul.f32 %v560_v34, %v99_v45 }
  0xa3   :  { %v396_v47 = vpack.c.bf16 %v259_v42, %v257_v44  ;;  %v398_v48 = vpack.c.bf16 %v258_v41, %v256_v43  ;;  %v143_v51 = vmul.f32 %v558_v33, %v94_v46  ;;  %v144_v52 = vmul.f32 %v560_v34, %v94_v46 }
  0xa5   :  { %397 = vmatprep.subr.bf16.mxu0 %v396_v47  ;;  %v201_v53 = vpop.permute.xlu1 %200 }
  0xa6   :  { %v196_v54 = vpop.permute.xlu0 %195  ;;  %v236_v55 = vadd.f32 %v201_v53, %v145_v49  ;;  %v237_v56 = vadd.f32 %v201_v53, %v146_v50  ;;  %399 = vmatpush1.bf16.msra.mxu0 %v398_v48 }
  0xa7   :  { %v234_v57 = vadd.f32 %v196_v54, %v143_v51  ;;  %v235_v58 = vadd.f32 %v196_v54, %v144_v52 }
  0xa8   :  { %v262_v59 = vmax.f32 %v236_v55, 0.0  ;;  %v263_v60 = vmax.f32 %v237_v56, 0.0 }
  0xa9   :  { %v260_v61 = vmax.f32 %v234_v57, 0.0  ;;  %v261_v62 = vmax.f32 %v235_v58, 0.0  ;;  %v109_v63 = vpop.permute.xlu1 %108 }
  0xaa   :  { %v104_v0 = vpop.permute.xlu0 %103  ;;  %v149_v3 = vmul.f32 %v558_v33, %v109_v63  ;;  %v150_v4 = vmul.f32 %v560_v34, %v109_v63 }
  0xab   :  { %v400_v1 = vpack.c.bf16 %v263_v60, %v261_v62  ;;  %v402_v2 = vpack.c.bf16 %v262_v59, %v260_v61  ;;  %v147_v5 = vmul.f32 %v558_v33, %v104_v0  ;;  %v148_v6 = vmul.f32 %v560_v34, %v104_v0 }
  0xad   :  { %401 = vmatprep.subr.bf16.mxu0 %v400_v1  ;;  %v211_v7 = vpop.permute.xlu1 %210 }
  0xae   :  { %v206_v8 = vpop.permute.xlu0 %205  ;;  %v240_v9 = vadd.f32 %v211_v7, %v149_v3  ;;  %v241_v10 = vadd.f32 %v211_v7, %v150_v4  ;;  %403 = vmatpush1.bf16.msra.mxu0 %v402_v2 }
  0xaf   :  { %v238_v11 = vadd.f32 %v206_v8, %v147_v5  ;;  %v239_v12 = vadd.f32 %v206_v8, %v148_v6 }
  0xb0   :  { %v266_v13 = vmax.f32 %v240_v9, 0.0  ;;  %v267_v14 = vmax.f32 %v241_v10, 0.0 }
  0xb1   :  { %v264_v15 = vmax.f32 %v238_v11, 0.0  ;;  %v265_v16 = vmax.f32 %v239_v12, 0.0  ;;  %v216_v22 = vpop.permute.xlu1 %215 }
  0xb2   :  { %v114_v17 = vpop.permute.xlu0 %113 }
  0xb3   :  { %v151_v18 = vmul.f32 %v558_v33, %v114_v17  ;;  %v152_v19 = vmul.f32 %v560_v34, %v114_v17  ;;  %v404_v20 = vpack.c.bf16 %v267_v14, %v265_v16  ;;  %v406_v21 = vpack.c.bf16 %v266_v13, %v264_v15 }
  0xb4   :  { %v440_v33 = vmov 1966171168   ;;  %v270_v34 = vstv %s612_s4 }
  0xb5   :  { %v242_v23 = vadd.f32 %v216_v22, %v151_v18  ;;  %v243_v24 = vadd.f32 %v216_v22, %v152_v19  ;;  %405 = vmatprep.subr.bf16.mxu0 %v404_v20  ;;  %v350_v30 = vunpack.c.l.s4 %v440_v33 }
  0xb6   :  { %407 = vmatpush1.bf16.msra.mxu0 %v406_v21 }
  0xb7   :  { %v268_v25 = vmax.f32 %v242_v23, 0.0  ;;  %v269_v26 = vmax.f32 %v243_v24, 0.0  ;;  %v351_v31 = vunpack.c.0.s8 %v350_v30 }
  0xb9   :  { %299 = vmatprep.subr.mxu0 %v269_v26  ;;  %v354_v38 = vsub.s32 %v351_v31, %v551_v29 }
  0xba   :  { %300 = vmatpush1.msra.mxu0 %v268_v25 }
  0xbb   :  { %383 = vmatmul.mubr.msk.f32.vlgmr.msra.gmra.mrb[0].mxu0 %vm271_vm0, %v48_v27 }
 0x18e   :  { %v341_v32 = vpop.f32.mrb[0].mxu0 }
 0x18f   :  { %v342_v35 = vadd.f32 %v341_v32, %v270_v34  ;;  %v343_v36 = vpop.f32.mrb[1].mxu0 }
 0x190   :  { %v344_v37 = vadd.f32 %v343_v36, %v270_v34 }
 0x192   :  { %v348_v39 = vcombine.low %v342_v35, %v344_v37 }
 0x194   :  { %v355_v40 = vrot.slane %v348_v39, %v354_v38 }
 0x196   :  { %v362_v41 = vrot.slane %v355_v40, %v354_v38 }
 0x198   :  { %368 = vst.msk [vmem:[#allocation3] sm:$0x3] %vm366_vm1, %v362_v41 }
 0x199   :  { %373 = vsyncadd [#allocation4], 16  ;;  %s441_s3 = smov [#allocation3]  }
 0x19a   :  { %s375_s23 = sshll.u32 %s441_s3, 4  ;;  %s376_s23 = int_to_ptr.vmem [resolvable:$true] %s375_s23 }
 0x19b   :  { %s414_s24 = scalar_lea.vmem %s376_s23, 16  ;;  %s418_s4 = scalar_lea.vmem %s376_s23, 32 }
 0x19c   :  { %p415_p0 = scmp.ne.s32.totalorder %s376_s23, %s414_s24  ;;  %p419_p1 = scmp.lt.s32.totalorder %s376_s23, %s376_s23 }
 0x19d   :  { %p420_p2 = scmp.lt.s32.totalorder %s418_s4, %s414_s24 }
 0x19f   :  { %p421_p3 = por %p420_p2, %p419_p1 }
 0x1a1   :  { %p422_p4 = pnand %p421_p3, %p415_p0 }
 0x1a3   :  { %425 = shalt.err (!%p422_p4)
}
 0x1a4   :  { %s426_s27 = scalar_lea.hbm %s613_s5, 16 }
 0x1a5   :  { %p427_p5 = scmp.ne.s32.totalorder %s613_s5, %s426_s27  ;;  %p430_p6 = scmp.lt.u32.totalorder %s426_s27, %s613_s5 }
 0x1a7   :  { %p432_p7 = pnand %p430_p6, %p427_p5 }
 0x1a9   :  { %435 = shalt.err (!%p432_p7)
}
 0x1aa   :  { %378 = dma.vmem_to_hbm [thread:$0]  %s376_s23, 16, %s613_s5, [#allocation4]  }
 0x1ab   :  { %436 = dma.done.wait [#allocation4], 32  }
 0x1ac   :  { %437 = vsyncadd [#allocation4], 4294967264 }
 0x1ad   :  { %382 = vsyncpa [#allocation4], 1 }

</bundles_post_ra>
